<compile_context>
chip_gen: v6e
topology: v6e:2x2x1
jax: 0.10.0
libtpu: 0.0.40
codegen_flags: <defaults>
</compile_context>

<pallas_src>
import functools

import jax
import jax.numpy as jnp
from jax.experimental import pallas as pl
from jax.experimental.pallas import tpu as pltpu

VMEM_SPEC = pl.BlockSpec(memory_space=pltpu.MemorySpace.VMEM)
SMEM_SPEC = pl.BlockSpec(memory_space=pltpu.MemorySpace.SMEM)

# Model hyper-parameters (small, consistent with the module's forward).
B, S, E, VOCAB, N_CLASS = 2, 8, 32, 50, 4
NUM_LAYERS, MIXUP_LAYER = 2, 1
HIDDEN = 128  # classifier hidden width from create_sentence_classifier


# ---------------------------------------------------------------- fused Pallas kernel
def _fused_forward_kernel(*refs, num_layers, mixup_layer, do_mixup, batch, seq):
    if do_mixup:
        (lam_ref,    # SMEM (1,)           f32   mixup lambda
         midx_ref,   # SMEM (B,)           i32   mixup_indices
         ids_ref,    # VMEM (B*S, 1)       i32   token ids
         mask_ref,   # VMEM (B, S, 1)      f32   attention mask
         emb_ref,    # VMEM (VOCAB, E)     bf16  embedding table
         wl_ref,     # VMEM (L, E, E)      bf16  encoder layer weights
         bl_ref,     # VMEM (L, 1, E)      f32   encoder layer biases
         cw1_ref,    # VMEM (E, HIDDEN)    bf16
         cb1_ref,    # VMEM (1, HIDDEN)    f32
         cw2_ref,    # VMEM (HIDDEN, C)    bf16
         cb2_ref,    # VMEM (1, C)         f32
         o_ref,      # VMEM (B, C)         f32   logits
         h_scr,      # VMEM (B*S, E)       f32   scratch for the mixup gather
         ) = refs
    else:
        (ids_ref, mask_ref, emb_ref, wl_ref, bl_ref,
         cw1_ref, cb1_ref, cw2_ref, cb2_ref, o_ref) = refs

    bs = batch * seq
    vocab = emb_ref.shape[0]
    dim = emb_ref.shape[1]

    # ---- embedding gather: one-hot(bf16) @ table(bf16), f32 accumulation ----
    # TODO(synk): for realistic vocab sizes replace with a scalar-prefetch-driven
    # row-gather DMA instead of a (BS, VOCAB) one-hot; fine at VOCAB=50.
    tok_iota = jax.lax.broadcasted_iota(jnp.int32, (bs, vocab), 1)
    onehot = (ids_ref[...] == tok_iota).astype(jnp.bfloat16)            # (BS, V)
    h = jnp.dot(onehot, emb_ref[...], preferred_element_type=jnp.float32)  # (BS, E) f32

    def layer(h, li):
        y = jnp.dot(h.astype(jnp.bfloat16), wl_ref[li],
                    preferred_element_type=jnp.float32) + bl_ref[li]
        return jnp.tanh(y)  # elementwise stays f32 (v5e has no bf16 VPU/EUP)

    # encoder[:mixup_layer]
    for li in range(mixup_layer):
        h = layer(h, li)

    # ---- TMix: lambda*h + (1-lambda)*h[mixup_indices] via dynamic row gather ----
    if do_mixup:
        h_scr[...] = h                       # read-only snapshot for the gather
        lam = lam_ref[0]
        rows = []
        for b in range(batch):               # static unroll; B scalar SMEM reads
            start = pl.multiple_of(midx_ref[b] * seq, seq)
            rows.append(h_scr[pl.ds(start, seq), :])
        h_perm = jnp.concatenate(rows, axis=0)           # (BS, E)
        h = lam * h + (1.0 - lam) * h_perm               # f32 blend

    # encoder[mixup_layer:]
    for li in range(mixup_layer, num_layers):
        h = layer(h, li)

    # ---- masked mean over seq: VPU multiply + XLU sum (no mask matmuls) ----
    m3 = mask_ref[...]                                    # (B, S, 1) f32
    h3 = h.reshape(batch, seq, dim)                       # split leading dim only
    num = jnp.sum(h3 * m3, axis=1)                        # (B, E)
    den = jnp.maximum(jnp.sum(m3, axis=1), 1.0)           # (B, 1), guard all-zero rows
    pooled = num / den                                    # exact divide (tolerance)

    # ---- classifier: Linear(E,128) -> Tanh -> Linear(128, n_class) ----
    z = jnp.tanh(
        jnp.dot(pooled.astype(jnp.bfloat16), cw1_ref[...],
                preferred_element_type=jnp.float32) + cb1_ref[...])
    logits = jnp.dot(z.astype(jnp.bfloat16), cw2_ref[...],
                     preferred_element_type=jnp.float32) + cb2_ref[...]
    o_ref[...] = logits.astype(o_ref.dtype)


# ---------------------------------------------------------------- one-time param prep
def prepare_params(params):
    """Hoisted out of the per-call path: bf16 MXU-operand copies + bias reshapes."""
    num_layers = params["wl"].shape[0]
    return {
        "emb": params["emb"].astype(jnp.bfloat16),
        "wl": params["wl"].astype(jnp.bfloat16),
        "bl": params["bl"].reshape(num_layers, 1, -1).astype(jnp.float32),
        "w1": params["w1"].astype(jnp.bfloat16),
        "b1": params["b1"].reshape(1, -1).astype(jnp.float32),
        "w2": params["w2"].astype(jnp.bfloat16),
        "b2": params["b2"].reshape(1, -1).astype(jnp.float32),
    }


# ---------------------------------------------------------------- forward wrapper
def forward(prepped, input_ids, attention_mask, mixup_indices=None, lambda_=None):
    bsz, seq = input_ids.shape
    emb = prepped["emb"]
    vocab, dim = emb.shape
    wl, bl = prepped["wl"], prepped["bl"]
    num_layers = wl.shape[0]
    cw1, cb1, cw2, cb2 = prepped["w1"], prepped["b1"], prepped["w2"], prepped["b2"]
    hidden = cw1.shape[1]
    n_class = cw2.shape[1]
    bs = bsz * seq
    do_mixup = mixup_indices is not None

    ids2d = input_ids.astype(jnp.int32).reshape(bs, 1)
    mask3 = attention_mask.astype(jnp.float32).reshape(bsz, seq, 1)

    common = (ids2d, mask3, emb, wl, bl, cw1, cb1, cw2, cb2)
    if do_mixup:
        lam = jnp.asarray([lambda_], jnp.float32)
        midx = mixup_indices.astype(jnp.int32).reshape(bsz)
        args = (lam, midx) + common
        in_specs = [SMEM_SPEC, SMEM_SPEC] + [VMEM_SPEC] * len(common)
        scratch_shapes = [pltpu.VMEM((bs, dim), jnp.float32)]
    else:
        args = common
        in_specs = [VMEM_SPEC] * len(common)
        scratch_shapes = []

    flops = (
        2 * bs * vocab * dim                     # embedding one-hot matmul
        + num_layers * 2 * bs * dim * dim        # encoder layers
        + (3 * bs * dim if do_mixup else 0)      # mixup blend (VPU)
        + 3 * bs * dim                           # masked-mean (VPU/XLU)
        + 2 * bsz * dim * hidden
        + 2 * bsz * hidden * n_class
    )
    transcendentals = num_layers * bs * dim + bsz * hidden
    bytes_accessed = (
        sum(int(a.size) * a.dtype.itemsize for a in args)
        + bsz * n_class * 4
    )

    kernel = functools.partial(
        _fused_forward_kernel,
        num_layers=num_layers,
        mixup_layer=MIXUP_LAYER,
        do_mixup=do_mixup,
        batch=bsz,
        seq=seq,
    )

    return pl.pallas_call(
        kernel,
        out_shape=jax.ShapeDtypeStruct((bsz, n_class), jnp.float32),
        in_specs=in_specs,
        out_specs=VMEM_SPEC,
        scratch_shapes=scratch_shapes,
        cost_estimate=pl.CostEstimate(
            flops=int(flops),
            transcendentals=int(transcendentals),
            bytes_accessed=int(bytes_accessed),
        ),
    )(*args)


def predict(prepped, input_ids, attention_mask):
    return jnp.argmax(forward(prepped, input_ids, attention_mask), axis=1)


# ---------------------------------------------------------------- pure-JAX reference
def forward_ref(params, input_ids, attention_mask, mixup_indices=None, lambda_=None):
    h = params["emb"][input_ids]
    for li in range(MIXUP_LAYER):
        h = jnp.tanh(h @ params["wl"][li] + params["bl"][li])
    if mixup_indices is not None:
        h = lambda_ * h + (1.0 - lambda_) * h[mixup_indices]
    for li in range(MIXUP_LAYER, NUM_LAYERS):
        h = jnp.tanh(h @ params["wl"][li] + params["bl"][li])
    m = attention_mask[:, :, None]
    pooled = jnp.sum(h * m, axis=1) / jnp.sum(m, axis=1)
    z = jnp.tanh(pooled @ params["w1"] + params["b1"])
    return z @ params["w2"] + params["b2"]


if __name__ == "__main__":
    key = jax.random.PRNGKey(0)
    k_ids, k_emb, k_lay, k_w1, k_w2 = jax.random.split(key, 5)

    input_ids = jax.random.randint(k_ids, (B, S), 0, VOCAB, dtype=jnp.int32)
    attention_mask = jnp.array(
        [[1, 1, 1, 1, 1, 1, 0, 0],
         [1, 1, 1, 1, 0, 0, 0, 0]], dtype=jnp.float32
    )
    mixup_indices = jnp.array([1, 0], dtype=jnp.int32)
    lambda_ = 0.7

    layer_keys = jax.random.split(k_lay, NUM_LAYERS)
    params = {
        "emb": 0.1 * jax.random.normal(k_emb, (VOCAB, E), jnp.float32),
        "wl": jnp.stack(
            [0.1 * jax.random.normal(layer_keys[i], (E, E), jnp.float32)
             for i in range(NUM_LAYERS)]
        ),
        "bl": jnp.full((NUM_LAYERS, 1, E), 0.01, jnp.float32),
        "w1": 0.1 * jax.random.normal(k_w1, (E, HIDDEN), jnp.float32),
        "b1": jnp.full((HIDDEN,), 0.02, jnp.float32),
        "w2": 0.1 * jax.random.normal(k_w2, (HIDDEN, N_CLASS), jnp.float32),
        "b2": jnp.full((N_CLASS,), 0.03, jnp.float32),
    }
    prepped = jax.tree_util.tree_map(jax.block_until_ready, prepare_params(params))

    # bf16 MXU operands (f32 accumulation) introduce ~1e-3 absolute error on
    # logits of magnitude ~0.2; compare against the pure-f32 reference at 2e-2.
    TOL = 2e-2

    # forward with TMix interpolation
    logits = forward(prepped, input_ids, attention_mask, mixup_indices, lambda_)
    logits = jax.block_until_ready(logits)
    ref = forward_ref(params, input_ids, attention_mask, mixup_indices, lambda_)
    assert logits.shape == (B, N_CLASS)
    assert jnp.allclose(logits, ref, atol=TOL, rtol=TOL), (logits, ref)

    # forward / predict without mixup (the predict() path — no dummy lam/midx args)
    logits_nm = forward(prepped, input_ids, attention_mask)
    logits_nm = jax.block_until_ready(logits_nm)
    ref_nm = forward_ref(params, input_ids, attention_mask)
    assert jnp.allclose(logits_nm, ref_nm, atol=TOL, rtol=TOL), (logits_nm, ref_nm)
    pred = jax.block_until_ready(predict(prepped, input_ids, attention_mask))
    assert jnp.array_equal(pred, jnp.argmax(ref_nm, axis=1))

    print("KERNEL_OK")
</pallas_src>

<mosaic_0001>
module attributes {stable_mosaic.version = 11 : i64} {
  func.func @_fused_forward_kernel(%arg0: memref<1xf32, #tpu.memory_space<smem>>, %arg1: memref<2xi32, #tpu.memory_space<smem>>, %arg2: memref<16x1xi32, #tpu.memory_space<vmem>>, %arg3: memref<2x8x1xf32, #tpu.memory_space<vmem>>, %arg4: memref<50x32xbf16, #tpu.memory_space<vmem>>, %arg5: memref<2x32x32xbf16, #tpu.memory_space<vmem>>, %arg6: memref<2x1x32xf32, #tpu.memory_space<vmem>>, %arg7: memref<32x128xbf16, #tpu.memory_space<vmem>>, %arg8: memref<1x128xf32, #tpu.memory_space<vmem>>, %arg9: memref<128x4xbf16, #tpu.memory_space<vmem>>, %arg10: memref<1x4xf32, #tpu.memory_space<vmem>>, %arg11: memref<2x4xf32, #tpu.memory_space<vmem>>, %arg12: memref<16x32xf32, #tpu.memory_space<vmem>>) attributes {dimension_semantics = [], scalar_prefetch = 0 : i64, scratch_operands = 1 : i64, tpu.core_type = #tpu.core_type<tc>} {
    %0 = tpu.iota {dimensions = array<i32: 1>} : vector<16x50xi32>
    %c0 = arith.constant 0 : index
    %c0_0 = arith.constant 0 : index
    %1 = vector.load %arg2[%c0, %c0_0] : memref<16x1xi32, #tpu.memory_space<vmem>>, vector<16x1xi32>
    %2 = vector.broadcast %1 : vector<16x1xi32> to vector<16x50xi32>
    %3 = arith.cmpi eq, %2, %0 : vector<16x50xi32>
    %4 = arith.extui %3 : vector<16x50xi1> to vector<16x50xi32>
    %5 = arith.sitofp %4 : vector<16x50xi32> to vector<16x50xf32>
    %6 = arith.truncf %5 : vector<16x50xf32> to vector<16x50xbf16>
    %c0_1 = arith.constant 0 : index
    %c0_2 = arith.constant 0 : index
    %7 = vector.load %arg4[%c0_1, %c0_2] : memref<50x32xbf16, #tpu.memory_space<vmem>>, vector<50x32xbf16>
    %cst = arith.constant dense<0.000000e+00> : vector<16x32xf32>
    %8 = tpu.matmul %6, %7, %cst {dimension_numbers = #tpu.dot_dimension_numbers<[1], [0], [0], [1], [0, 0, 1, 1], [], []>} : vector<16x50xbf16>, vector<50x32xbf16>, vector<16x32xf32> -> vector<16x32xf32>
    %9 = arith.truncf %8 : vector<16x32xf32> to vector<16x32xbf16>
    %c0_3 = arith.constant 0 : index
    %c0_4 = arith.constant 0 : index
    %c0_5 = arith.constant 0 : index
    %10 = vector.load %arg5[%c0_3, %c0_4, %c0_5] : memref<2x32x32xbf16, #tpu.memory_space<vmem>>, vector<1x32x32xbf16>
    %11 = vector.shape_cast %10 : vector<1x32x32xbf16> to vector<32x32xbf16>
    %cst_6 = arith.constant dense<0.000000e+00> : vector<16x32xf32>
    %12 = tpu.matmul %9, %11, %cst_6 {dimension_numbers = #tpu.dot_dimension_numbers<[1], [0], [0], [1], [0, 0, 1, 1], [], []>} : vector<16x32xbf16>, vector<32x32xbf16>, vector<16x32xf32> -> vector<16x32xf32>
    %c0_7 = arith.constant 0 : index
    %c0_8 = arith.constant 0 : index
    %c0_9 = arith.constant 0 : index
    %13 = vector.load %arg6[%c0_7, %c0_8, %c0_9] : memref<2x1x32xf32, #tpu.memory_space<vmem>>, vector<1x1x32xf32>
    %14 = vector.shape_cast %13 : vector<1x1x32xf32> to vector<1x32xf32>
    %15 = vector.broadcast %14 : vector<1x32xf32> to vector<16x32xf32>
    %16 = arith.addf %12, %15 : vector<16x32xf32>
    %17 = math.tanh %16 : vector<16x32xf32>
    %c0_10 = arith.constant 0 : index
    %c0_11 = arith.constant 0 : index
    %18 = vector.load %arg12[%c0_10, %c0_11] : memref<16x32xf32, #tpu.memory_space<vmem>>, vector<16x32xf32>
    tpu.vector_store %arg12[%c0_10, %c0_11], %17 {strides = array<i32>} : memref<16x32xf32, #tpu.memory_space<vmem>>, vector<16x32xf32>,
    %c0_12 = arith.constant 0 : index
    %19 = memref.load %arg0[%c0_12] : memref<1xf32, #tpu.memory_space<smem>>
    %c0_13 = arith.constant 0 : index
    %20 = memref.load %arg1[%c0_13] : memref<2xi32, #tpu.memory_space<smem>>
    %c8_i32 = arith.constant 8 : i32
    %21 = arith.muli %20, %c8_i32 : i32
    %22 = tpu.assume_multiple %21, 8 : i32
    %23 = arith.index_cast %22 : i32 to index
    %c0_14 = arith.constant 0 : index
    %24 = vector.load %arg12[%23, %c0_14] : memref<16x32xf32, #tpu.memory_space<vmem>>, vector<8x32xf32>
    %c1 = arith.constant 1 : index
    %25 = memref.load %arg1[%c1] : memref<2xi32, #tpu.memory_space<smem>>
    %c8_i32_15 = arith.constant 8 : i32
    %26 = arith.muli %25, %c8_i32_15 : i32
    %27 = tpu.assume_multiple %26, 8 : i32
    %28 = arith.index_cast %27 : i32 to index
    %c0_16 = arith.constant 0 : index
    %29 = vector.load %arg12[%28, %c0_16] : memref<16x32xf32, #tpu.memory_space<vmem>>, vector<8x32xf32>
    %30 = tpu.concatenate %24, %29 in 0 : vector<8x32xf32>, vector<8x32xf32> -> vector<16x32xf32>
    %31 = vector.broadcast %19 : f32 to vector<16x32xf32>
    %32 = arith.mulf %31, %17 : vector<16x32xf32>
    %cst_17 = arith.constant 1.000000e+00 : f32
    %33 = arith.subf %cst_17, %19 : f32
    %34 = vector.broadcast %33 : f32 to vector<16x32xf32>
    %35 = arith.mulf %34, %30 : vector<16x32xf32>
    %36 = arith.addf %32, %35 : vector<16x32xf32>
    %37 = arith.truncf %36 : vector<16x32xf32> to vector<16x32xbf16>
    %c1_18 = arith.constant 1 : index
    %c0_19 = arith.constant 0 : index
    %c0_20 = arith.constant 0 : index
    %38 = vector.load %arg5[%c1_18, %c0_19, %c0_20] : memref<2x32x32xbf16, #tpu.memory_space<vmem>>, vector<1x32x32xbf16>
    %39 = vector.shape_cast %38 : vector<1x32x32xbf16> to vector<32x32xbf16>
    %cst_21 = arith.constant dense<0.000000e+00> : vector<16x32xf32>
    %40 = tpu.matmul %37, %39, %cst_21 {dimension_numbers = #tpu.dot_dimension_numbers<[1], [0], [0], [1], [0, 0, 1, 1], [], []>} : vector<16x32xbf16>, vector<32x32xbf16>, vector<16x32xf32> -> vector<16x32xf32>
    %c1_22 = arith.constant 1 : index
    %c0_23 = arith.constant 0 : index
    %c0_24 = arith.constant 0 : index
    %41 = vector.load %arg6[%c1_22, %c0_23, %c0_24] : memref<2x1x32xf32, #tpu.memory_space<vmem>>, vector<1x1x32xf32>
    %42 = vector.shape_cast %41 : vector<1x1x32xf32> to vector<1x32xf32>
    %43 = vector.broadcast %42 : vector<1x32xf32> to vector<16x32xf32>
    %44 = arith.addf %40, %43 : vector<16x32xf32>
    %45 = math.tanh %44 : vector<16x32xf32>
    %c0_25 = arith.constant 0 : index
    %c0_26 = arith.constant 0 : index
    %c0_27 = arith.constant 0 : index
    %46 = vector.load %arg3[%c0_25, %c0_26, %c0_27] : memref<2x8x1xf32, #tpu.memory_space<vmem>>, vector<2x8x1xf32>
    %47 = vector.shape_cast %45 : vector<16x32xf32> to vector<2x8x32xf32>
    %48 = vector.broadcast %46 : vector<2x8x1xf32> to vector<2x8x32xf32>
    %49 = arith.mulf %47, %48 : vector<2x8x32xf32>
    %cst_28 = arith.constant dense<0.000000e+00> : vector<2x32xf32>
    %50 = vector.multi_reduction <add>, %49, %cst_28 [1] : vector<2x8x32xf32> to vector<2x32xf32>
    %cst_29 = arith.constant dense<0.000000e+00> : vector<2x1xf32>
    %51 = vector.multi_reduction <add>, %46, %cst_29 [1] : vector<2x8x1xf32> to vector<2x1xf32>
    %cst_30 = arith.constant 1.000000e+00 : f32
    %52 = vector.broadcast %cst_30 : f32 to vector<2x1xf32>
    %53 = arith.maximumf %51, %52 : vector<2x1xf32>
    %54 = vector.broadcast %53 : vector<2x1xf32> to vector<2x32xf32>
    %55 = arith.divf %50, %54 : vector<2x32xf32>
    %56 = arith.truncf %55 : vector<2x32xf32> to vector<2x32xbf16>
    %c0_31 = arith.constant 0 : index
    %c0_32 = arith.constant 0 : index
    %57 = vector.load %arg7[%c0_31, %c0_32] : memref<32x128xbf16, #tpu.memory_space<vmem>>, vector<32x128xbf16>
    %cst_33 = arith.constant dense<0.000000e+00> : vector<2x128xf32>
    %58 = tpu.matmul %56, %57, %cst_33 {dimension_numbers = #tpu.dot_dimension_numbers<[1], [0], [0], [1], [0, 0, 1, 1], [], []>} : vector<2x32xbf16>, vector<32x128xbf16>, vector<2x128xf32> -> vector<2x128xf32>
    %c0_34 = arith.constant 0 : index
    %c0_35 = arith.constant 0 : index
    %59 = vector.load %arg8[%c0_34, %c0_35] : memref<1x128xf32, #tpu.memory_space<vmem>>, vector<1x128xf32>
    %60 = vector.broadcast %59 : vector<1x128xf32> to vector<2x128xf32>
    %61 = arith.addf %58, %60 : vector<2x128xf32>
    %62 = math.tanh %61 : vector<2x128xf32>
    %63 = arith.truncf %62 : vector<2x128xf32> to vector<2x128xbf16>
    %c0_36 = arith.constant 0 : index
    %c0_37 = arith.constant 0 : index
    %64 = vector.load %arg9[%c0_36, %c0_37] : memref<128x4xbf16, #tpu.memory_space<vmem>>, vector<128x4xbf16>
    %cst_38 = arith.constant dense<0.000000e+00> : vector<2x4xf32>
    %65 = tpu.matmul %63, %64, %cst_38 {dimension_numbers = #tpu.dot_dimension_numbers<[1], [0], [0], [1], [0, 0, 1, 1], [], []>} : vector<2x128xbf16>, vector<128x4xbf16>, vector<2x4xf32> -> vector<2x4xf32>
    %c0_39 = arith.constant 0 : index
    %c0_40 = arith.constant 0 : index
    %66 = vector.load %arg10[%c0_39, %c0_40] : memref<1x4xf32, #tpu.memory_space<vmem>>, vector<1x4xf32>
    %67 = vector.broadcast %66 : vector<1x4xf32> to vector<2x4xf32>
    %68 = arith.addf %65, %67 : vector<2x4xf32>
    %c0_41 = arith.constant 0 : index
    %c0_42 = arith.constant 0 : index
    %69 = vector.load %arg11[%c0_41, %c0_42] : memref<2x4xf32, #tpu.memory_space<vmem>>, vector<2x4xf32>
    tpu.vector_store %arg11[%c0_41, %c0_42], %68 {strides = array<i32>} : memref<2x4xf32, #tpu.memory_space<vmem>>, vector<2x4xf32>,
    return
  }
}

</mosaic_0001>

<bundles_post_ra>
// kernel: tpu_custom_call.1
= control target key start
LH: loop header
LB: loop body
LE: loop exit
PB: predicated region body
PF: predicated region fallthrough
CT: control target
= control target key end

     0   :  { %17 = vsyncpa [#allocation6], 0  ;;  %s963_s0 = inlined_call_operand.<no memory space> [shape: f32[1], index: 0, kind: input, shape index: {}]   ;;  %s964_s1 = inlined_call_operand.vmem [shape: s32[2], index: 1, kind: input, shape index: {}]   ;;  %s965_s2 = inlined_call_operand.vmem [shape: s32[16,1], index: 2, kind: input, shape index: {}]   ;;  %s966_s3 = inlined_call_operand.vmem [shape: f32[2,8,1], index: 3, kind: input, shape index: {}]   ;;  %s967_s4 = inlined_call_operand.vmem [shape: bf16[50,32], index: 4, kind: input, shape index: {}]   ;;  %s968_s5 = inlined_call_operand.vmem [shape: bf16[2,32,32], index: 5, kind: input, shape index: {}]   ;;  %s969_s6 = inlined_call_operand.vmem [shape: f32[2,1,32], index: 6, kind: input, shape index: {}]   ;;  %s970_s7 = inlined_call_operand.vmem [shape: bf16[32,128], index: 7, kind: input, shape index: {}]   ;;  %s971_s8 = inlined_call_operand.vmem [shape: f32[1,128], index: 8, kind: input, shape index: {}]   ;;  %s972_s9 = inlined_call_operand.vmem [shape: bf16[128,4], index: 9, kind: input, shape index: {}]   ;;  %s973_s10 = inlined_call_operand.vmem [shape: f32[1,4], index: 10, kind: input, shape index: {}]   ;;  %s974_s11 = inlined_call_operand.hbm [shape: f32[2,4], index: 11, kind: output, shape index: {}]  }
   0x1   :  { %18 = vsyncpa [#allocation5], 0  ;;  %s27_s19 = sshll.u32 %s964_s1, 4  ;;  %s28_s19 = int_to_ptr.vmem [resolvable:$true] %s27_s19 }
   0x2   :  { %s733_s20 = scalar_lea.vmem %s28_s19, 16  ;;  %p738_p1 = scmp.lt.s32.totalorder %s28_s19, %s28_s19 }
   0x3   :  { %p734_p0 = scmp.ne.s32.totalorder %s28_s19, %s733_s20  ;;  %p739_p2 = scmp.lt.s32.totalorder %s733_s20, %s733_s20 }
   0x5   :  { %p740_p3 = por %p739_p2, %p738_p1 }
   0x7   :  { %p741_p4 = pnand %p740_p3, %p734_p0 }
   0x9   :  { %744 = shalt.err (!%p741_p4)
}
   0xa   :  { %s769_s21 = smov [#allocation4]  }
   0xb   :  { %30 = dma.vmem_to_smem %s28_s19, 16, %s769_s21, [#allocation6]  }
   0xc   :  { %765 = dma.done.wait [#allocation6], 16  }
   0xd   :  { %766 = vsyncadd [#allocation6], 4294967280 }
   0xe   :  { %52 = sfence }
   0xf   :  { %v56_v0 = vld [vmem:[%s965_s2] sm:$0xff]  ;;  %vm339_vm0 = vcmask 7168   ;;  %v770_v2 = vmov 0   ;;  %v771_v4 = vmov 0.0   ;;  %vm103_vm1 = vcmask 1040384   ;;  %v57_v7 = vld [vmem:[%s965_s2 + $0x8] sm:$0xff] }
  0x10   :  { %v311_v1 = vld [vmem:[%s966_s3] sm:$0xff]  ;;  %699 = vset.pattern.permute.xlu0 %v770_v2  ;;  %638 = vmatprep.subr.bf16.mxu0 %v771_v4  ;;  %v701_v5 = vld [vmem:[%s967_s4 + $0x18] ss:$0 sps:$4 sm:$0x11]   ;;  %v702_v9 = vld [vmem:[%s967_s4 + $0x10] sm:$0xff]   ;;  %vm772_vm2 = vmmov 0   ;;  %v54_v18 = vlaneseq  ;;  %v230_v52 = vstv %s963_s0 }
  0x11   :  { %v340_v3 = vsel %vm339_vm0, %v311_v1, 0.0  ;;  %59 = vperm.xlu0 %699, %v56_v0   ;;  %658 = vmatprep.subr.bf16.mxu1 %v771_v4  ;;  %v105_v8 = vsel %vm103_vm1, %v701_v5, 0  ;;  %v703_v12 = vld [vmem:[%s967_s4 + $0x8] sm:$0xff]   ;;  %v704_v16 = vld [vmem:[%s967_s4] sm:$0xff]   ;;  %vm99_vm5 = vcmask 408576   ;;  %vm172_vm6 = vcmask 261120  }
  0x12   :  { %v341_v6 = vrot.slane %v340_v3, 4  ;;  %700 = vset.pattern.permute.xlu1 %v770_v2  ;;  %639 = vmatpush3.bf16.msra.mxu0 %v105_v8  ;;  %v55_v19 = vand.u32 127, %v54_v18  ;;  %v705_v24 = vld [vmem:[%s968_s5 + $0x8] sm:$0xff]   ;;  %v706_v26 = vld [vmem:[%s968_s5] sm:$0xff]   ;;  %v707_v32 = vld [vmem:[%s968_s5 + $0x18] sm:$0xff]   ;;  %s591_s25 = sld [smem:[#allocation4 + $0x1]] }
  0x13   :  { %315 = vperm.xlu1 %700, %v311_v1   ;;  %640 = vmatprep.subr.bf16.mxu0 %v771_v4  ;;  %v708_v33 = vld [vmem:[%s968_s5 + $0x10] sm:$0xff]   ;;  %v312_v34 = vld [vmem:[%s966_s3 + $0x8] sm:$0xff]  ;;  %v586_v43 = vld [vmem:[%s969_s6] ss:$0 sm:$0xff]  ;;  %s222_s3 = sld [smem:[#allocation4]]  ;;  %vm387_vm7 = vcmask 1041409  }
  0x14   :  { %v342_v10 = vadd.f32 %v341_v6, %v340_v3  ;;  %646 = vmatprep.mubr.msk.bf16.mxu0 %vm772_vm2, %v771_v4  ;;  %662 = vmatprep.mubr.msk.bf16.mxu1 %vm772_vm2, %v771_v4  ;;  %v347_v35 = vsel %vm339_vm0, %v312_v34, 0.0  ;;  %s233_s29 = ssub.f32 1.0, %s963_s0  ;;  %v709_v63 = vld [vmem:[%s970_s7 + $0x8] sm:$0xff]   ;;  %v710_v0 = vld [vmem:[%s970_s7] sm:$0xff]   ;;  %v711_v1 = vld [vmem:[%s972_s9 + $0x38] sm:$0xff]   ;;  %vm558_vm8 = vcmask 25600  }
  0x15   :  { %62 = vperm.xlu0 %699, %v57_v7   ;;  %659 = vmatpush3.bf16.msra.mxu1 %v707_v32  ;;  %v348_v36 = vrot.slane %v347_v35, 4  ;;  %v712_v2 = vld [vmem:[%s972_s9 + $0x30] sm:$0xff]   ;;  %v713_v3 = vld [vmem:[%s972_s9 + $0x28] sm:$0xff]   ;;  %v598_v5 = vld [vmem:[%s969_s6 + $0x1] ss:$0 sm:$0xff] }
  0x16   :  { %v343_v11 = vrot.slane %v342_v10, 2  ;;  %641 = vmatpush3.bf16.msra.mxu0 %v702_v9  ;;  %660 = vmatprep.subr.bf16.mxu1 %v771_v4  ;;  %v234_v53 = vstv %s233_s29 }
  0x17   :  { %642 = vmatprep.subr.bf16.mxu0 %v771_v4  ;;  %320 = vperm.xlu1 %700, %v312_v34   ;;  %v349_v37 = vadd.f32 %v348_v36, %v347_v35 }
  0x18   :  { %v344_v13 = vadd.f32 %v343_v11, %v342_v10  ;;  %s592_s26 = sshll.u32 %s591_s25, 3 }
  0x19   :  { %661 = vmatpush3.bf16.msra.mxu1 %v708_v33  ;;  %v350_v38 = vrot.slane %v349_v37, 2  ;;  %s590_s1 = sshll.u32 %s222_s3, 3  ;;  %s228_s2 = scalar_lea.vmem [#allocation2], %s592_s26 }
  0x1a   :  { %v345_v14 = vrot.slane %v344_v13, 1  ;;  %643 = vmatpush3.bf16.msra.mxu0 %v703_v12  ;;  %674 = vmatprep.subr.bf16.mxu1 %v771_v4  ;;  %s224_s13 = scalar_lea.vmem [#allocation2], %s590_s1 }
  0x1b   :  { %644 = vmatprep.subr.bf16.mxu0 %v771_v4  ;;  %v351_v39 = vadd.f32 %v350_v38, %v349_v37 }
  0x1c   :  { %v346_v15 = vadd.f32 %v345_v14, %v344_v13 }
  0x1d   :  { %v352_v40 = vrot.slane %v351_v39, 1 }
  0x1e   :  { %v354_v17 = vmax.f32 %v346_v15, 1.0  ;;  %645 = vmatpush3.bf16.msra.mxu0 %v704_v16 }
  0x1f   :  { %650 = vmatprep.subr.bf16.mxu0 %v771_v4  ;;  %v353_v41 = vadd.f32 %v352_v40, %v351_v39 }
  0x20   :  { %358 = vperm.xlu0 %699, %v354_v17  }
  0x21   :  { %v355_v42 = vmax.f32 %v353_v41, 1.0 }
  0x23   :  { %363 = vperm.xlu1 %700, %v355_v42  }
  0x8c   :  { %v60_v20 = vpop.permute.xlu0 %59 }
  0x8d   :  { %vm64_vm3 = vcmp.eq.s32.totalorder %v60_v20, %v55_v19 }
  0x8e   :  { %v579_v22 = vsel %vm64_vm3, 1.0, %v771_v4  ;;  %v316_v12 = vpop.permute.xlu1 %315 }
  0x90   :  { %v63_v21 = vpop.permute.xlu0 %62 }
  0x91   :  { %vm65_vm4 = vcmp.eq.s32.totalorder %v63_v21, %v55_v19 }
  0x92   :  { %v580_v23 = vsel %vm65_vm4, 1.0, %v771_v4  ;;  %v321_v13 = vpop.permute.xlu1 %320 }
  0x93   :  { %v70_v25 = vpack.c.bf16 %v580_v23, %v579_v22 }
  0x95   :  { %647 = vmatmul.mubr.msk.bf16.vlgmr.msra.gmra.mxu0 %vm99_vm5, %v70_v25 }
  0x96   :  { %651 = vmatpush3.bf16.msra.mxu0 %v705_v24  ;;  %654 = vmatprep.mubr.msk.bf16.mxu0 %vm772_vm2, %v771_v4 }
  0x97   :  { %652 = vmatprep.subr.bf16.mxu0 %v771_v4 }
  0x9a   :  { %653 = vmatpush3.bf16.msra.mxu0 %v706_v26 }
  0x9b   :  { %666 = vmatprep.subr.bf16.mxu0 %v771_v4  ;;  %v359_v14 = vpop.permute.xlu0 %358 }
  0x9e   :  { %v364_v18 = vpop.permute.xlu1 %363 }
 0x155   :  { %v141_v27 = vpop.f32.mrf.mxu0 }
 0x157   :  { %v648_v28 = vpop.f32.mrf.mxu0 }
 0x159   :  { %v144_v29 = vpop.f32.mrf.mxu0 }
 0x15a   :  { %v148_v30 = vpack.c.bf16 %v144_v29, %v141_v27 }
 0x15b   :  { %v649_v31 = vpop.f32.mrf.mxu0 }
 0x15c   :  { %655 = vmatmul.mubr.msk.bf16.vlgmr.msra.gmra.mxu0 %vm172_vm6, %v148_v30 }
 0x15d   :  { %670 = vmatprep.mubr.msk.bf16.mxu0 %vm772_vm2, %v771_v4  ;;  %667 = vmatpush3.bf16.msra.mxu0 %v709_v63 }
 0x15e   :  { %668 = vmatprep.subr.bf16.mxu0 %v771_v4 }
 0x161   :  { %669 = vmatpush3.bf16.msra.mxu0 %v710_v0 }
 0x21c   :  { %v210_v44 = vpop.f32.mrf.mxu0 }
 0x21d   :  { %v211_v45 = vadd.f32 %v586_v43, %v210_v44  ;;  %v714_v44 = vld [vmem:[%s972_s9 + $0x20] sm:$0xff]  }
 0x21e   :  { %v656_v46 = vpop.f32.mrf.mxu0 }
 0x21f   :  { %719 = vtanh.f32 %v211_v45  ;;  %v715_v45 = vld [vmem:[%s972_s9 + $0x18] sm:$0xff]   ;;  %v716_v46 = vld [vmem:[%s972_s9 + $0x10] sm:$0xff]  }
 0x220   :  { %v213_v47 = vpop.f32.mrf.mxu0 }
 0x221   :  { %v214_v48 = vadd.f32 %v586_v43, %v213_v47  ;;  %v717_v47 = vld [vmem:[%s972_s9 + $0x8] sm:$0xff]  }
 0x222   :  { %v657_v49 = vpop.f32.mrf.mxu0 }
 0x223   :  { %721 = vtanh.f32 %v214_v48  ;;  %v718_v48 = vld [vmem:[%s972_s9] sm:$0xff]  }
 0x224   :  { %v602_v49 = vld [vmem:[%s971_s8] ss:$0 sm:$0xff] }
 0x22c   :  { %v720_v50 = vpop.eup %719 }
 0x22d   :  { %219 = vst.msk [vmem:[#allocation2] sm:$0xff] %vm172_vm6, %v720_v50  ;;  %v231_v56 = vmul.f32 %v720_v50, %v230_v52 }
 0x230   :  { %v722_v51 = vpop.eup %721 }
 0x231   :  { %220 = vst.msk [vmem:[#allocation2 + $0x8] sm:$0xff] %vm172_vm6, %v722_v51  ;;  %v232_v57 = vmul.f32 %v722_v51, %v230_v52 }
 0x238   :  { %v225_v54 = vld [vmem:[%s224_s13] sm:$0xff] }
 0x239   :  { %v229_v55 = vld [vmem:[%s228_s2] sm:$0xff]  ;;  %v235_v58 = vmul.f32 %v234_v53, %v225_v54  ;;  %s773_s2 = smov [#allocation7]  }
 0x23a   :  { %v236_v59 = vmul.f32 %v234_v53, %v229_v55  ;;  %s566_s9 = sshll.u32 %s773_s2, 4  ;;  %s567_s9 = int_to_ptr.vmem [resolvable:$true] %s566_s9 }
 0x23b   :  { %v237_v60 = vadd.f32 %v235_v58, %v231_v56  ;;  %s745_s8 = scalar_lea.vmem %s567_s9, 32  ;;  %p750_p6 = scmp.lt.s32.totalorder %s567_s9, %s567_s9 }
 0x23c   :  { %v238_v61 = vadd.f32 %v236_v59, %v232_v57  ;;  %p746_p5 = scmp.ne.s32.totalorder %s567_s9, %s745_s8  ;;  %p751_p7 = scmp.lt.s32.totalorder %s745_s8, %s745_s8 }
 0x23e   :  { %v239_v62 = vpack.c.bf16 %v238_v61, %v237_v60  ;;  %p752_p8 = por %p751_p7, %p750_p6 }
 0x240   :  { %663 = vmatmul.mubr.msk.bf16.vlgmr.msra.gmra.mxu1 %vm172_vm6, %v239_v62  ;;  %p753_p9 = pnand %p752_p8, %p746_p5 }
 0x241   :  { %690 = vmatprep.mubr.msk.bf16.mxu1 %vm772_vm2, %v771_v4  ;;  %675 = vmatpush3.bf16.msra.mxu1 %v711_v1 }
 0x242   :  { %676 = vmatprep.subr.bf16.mxu1 %v771_v4 }
 0x245   :  { %677 = vmatpush3.bf16.msra.mxu1 %v712_v2 }
 0x246   :  { %678 = vmatprep.subr.bf16.mxu1 %v771_v4 }
 0x249   :  { %679 = vmatpush3.bf16.msra.mxu1 %v713_v3 }
 0x24a   :  { %680 = vmatprep.subr.bf16.mxu1 %v771_v4 }
 0x24d   :  { %681 = vmatpush3.bf16.msra.mxu1 %v714_v44 }
 0x24e   :  { %682 = vmatprep.subr.bf16.mxu1 %v771_v4 }
 0x251   :  { %683 = vmatpush3.bf16.msra.mxu1 %v715_v45 }
 0x252   :  { %684 = vmatprep.subr.bf16.mxu1 %v771_v4 }
 0x255   :  { %685 = vmatpush3.bf16.msra.mxu1 %v716_v46 }
 0x256   :  { %686 = vmatprep.subr.bf16.mxu1 %v771_v4 }
 0x259   :  { %687 = vmatpush3.bf16.msra.mxu1 %v717_v47 }
 0x25a   :  { %688 = vmatprep.subr.bf16.mxu1 %v771_v4  ;;  %v606_v4 = vld [vmem:[%s973_s10] ss:$0 sm:$0xff] }
 0x25d   :  { %689 = vmatpush3.bf16.msra.mxu1 %v718_v48 }
 0x300   :  { %v302_v6 = vpop.f32.mrf.mxu1 }
 0x301   :  { %v303_v7 = vadd.f32 %v598_v5, %v302_v6 }
 0x302   :  { %v664_v8 = vpop.f32.mrf.mxu1 }
 0x303   :  { %723 = vtanh.f32 %v303_v7 }
 0x304   :  { %v305_v9 = vpop.f32.mrf.mxu1 }
 0x305   :  { %v306_v10 = vadd.f32 %v598_v5, %v305_v9 }
 0x306   :  { %v665_v11 = vpop.f32.mrf.mxu1 }
 0x307   :  { %725 = vtanh.f32 %v306_v10 }
 0x308   :  { %727 = vrcp.f32 %v359_v14 }
 0x309   :  { %729 = vrcp.f32 %v364_v18 }
 0x310   :  { %v724_v15 = vpop.eup %723 }
 0x311   :  { %v323_v16 = vmul.f32 %v724_v15, %v316_v12 }
 0x313   :  { %v325_v17 = vsel %vm172_vm6, %v323_v16, 0.0 }
 0x314   :  { %v726_v19 = vpop.eup %725  ;;  %v326_v20 = vrot.slane %v325_v17, 4 }
 0x315   :  { %v324_v21 = vmul.f32 %v726_v19, %v321_v13  ;;  %v728_v32 = vpop.eup %727 }
 0x316   :  { %v327_v22 = vadd.f32 %v326_v20, %v325_v17  ;;  %v730_v36 = vpop.eup %729 }
 0x317   :  { %v332_v23 = vsel %vm172_vm6, %v324_v21, 0.0 }
 0x318   :  { %v328_v24 = vrot.slane %v327_v22, 2  ;;  %v333_v25 = vrot.slane %v332_v23, 4 }
 0x31a   :  { %v329_v26 = vadd.f32 %v328_v24, %v327_v22  ;;  %v334_v27 = vadd.f32 %v333_v25, %v332_v23 }
 0x31c   :  { %v330_v28 = vrot.slane %v329_v26, 1  ;;  %v335_v29 = vrot.slane %v334_v27, 2 }
 0x31e   :  { %v331_v30 = vadd.f32 %v330_v28, %v329_v26  ;;  %v336_v31 = vadd.f32 %v335_v29, %v334_v27 }
 0x320   :  { %v367_v33 = vmul.f32 %v728_v32, %v331_v30  ;;  %v337_v34 = vrot.slane %v336_v31, 1 }
 0x322   :  { %v338_v35 = vadd.f32 %v337_v34, %v336_v31  ;;  %v370_v37 = vpack.c.bf16 %v367_v33, %v367_v33 }
 0x324   :  { %v369_v38 = vmul.f32 %v730_v36, %v338_v35  ;;  %v385_v40 = vunpack.c.l.b16 %v370_v37 }
 0x326   :  { %v371_v39 = vpack.c.bf16 %v369_v38, %v369_v38 }
 0x328   :  { %v386_v41 = vunpack.c.l.b16 %v371_v39 }
 0x32a   :  { %v388_v42 = vsel %vm387_vm7, %v386_v41, %v385_v40 }
 0x32b   :  { %v389_v43 = vpack.c.b16 %v388_v42, %v388_v42 }
 0x32d   :  { %671 = vmatmul.mubr.msk.bf16.vlgmr.msra.gmra.mxu0 %vm172_vm6, %v389_v43 }
 0x3ed   :  { %v439_v50 = vpop.f32.mrf.mxu0 }
 0x3ee   :  { %v440_v51 = vadd.f32 %v602_v49, %v439_v50 }
 0x3ef   :  { %v672_v52 = vpop.f32.mrf.mxu0 }
 0x3f0   :  { %731 = vtanh.f32 %v440_v51 }
 0x3f1   :  { %v442_v53 = vpop.f32.mrf.mxu0 }
 0x3f3   :  { %v673_v54 = vpop.f32.mrf.mxu0 }
 0x3fd   :  { %v732_v55 = vpop.eup %731 }
 0x3fe   :  { %v446_v56 = vpack.c.bf16 %v732_v55, %v732_v55 }
 0x400   :  { %691 = vmatmul.mubr.bf16.vlgmr.msra.gmra.mxu1 %v446_v56 }
 0x4c0   :  { %v552_v57 = vpop.f32.mrf.mxu1 }
 0x4c1   :  { %v553_v58 = vadd.f32 %v606_v4, %v552_v57 }
 0x4c2   :  { %v692_v59 = vpop.f32.mrf.mxu1 }
 0x4c3   :  { %559 = vst.msk [vmem:[#allocation7] sm:$0x3] %vm558_vm8, %v553_v58 }
 0x4c4   :  { %v555_v60 = vpop.f32.mrf.mxu1 }
 0x4c5   :  { %756 = shalt.err (!%p753_p9)
}
 0x4c6   :  { %569 = dma.vmem_to_hbm [thread:$0]  %s567_s9, 32, %s974_s11, [#allocation5]   ;;  %v693_v61 = vpop.f32.mrf.mxu1 }
 0x4c7   :  { %767 = dma.done.wait [#allocation5], 32  }
 0x4c8   :  { %768 = vsyncadd [#allocation5], 4294967264 }
 0x4c9   :  { %573 = vsyncpa [#allocation5], 1 }
 0x4ca   :  { %574 = vsyncpa [#allocation6], 1 }

</bundles_post_ra>
